<compile_context>
chip_gen: v5e
topology: v5e:2x2
jax: 0.10.0
libtpu: 0.0.40
codegen_flags: <defaults>
</compile_context>

<pallas_src>
import math

import jax
import jax.numpy as jnp
from jax.experimental import pallas as pl
from jax.experimental.pallas import tpu as pltpu


def _round_up(x: int, m: int) -> int:
    return ((x + m - 1) // m) * m


def _cdiv(a: int, b: int) -> int:
    return (a + b - 1) // b


def _sublane(dtype) -> int:
    # 8 sublanes for 4-byte, 16 for 2-byte, 32 for 1-byte dtypes.
    return max(8, 32 // max(1, jnp.dtype(dtype).itemsize))


# ----------------------------- Pallas kernel --------------------------------
def fc_probe_kernel(x_ref, we_ref, be_ref, w1_ref, b1_ref, w2_ref, b2_ref,
                    o_ref, acc_ref):
    """Fused embedder projection (K-tiled) + 2-layer MLP probe.

    Grid = (batch tiles, K tiles).  Per step:
      x_ref  : (tb, tk)   input tile (original dtype; cast in-kernel)
      we_ref : (tk, E_p)  embedder weight K-slice (compute dtype)
      be/w1/b1/w2/b2 : resident probe params (constant index_map)
      o_ref  : (tb, C_p)  f32 logits, lane-dense, written on the last K step
      acc_ref: (tb, E_p)  f32 embedder accumulator scratch
    """
    k = pl.program_id(1)
    cdt = we_ref.dtype

    @pl.when(k == 0)
    def _():
        acc_ref[...] = jnp.zeros_like(acc_ref)

    # Dominant GEMM: accumulate this K slice into the f32 scratch.
    acc_ref[...] += jnp.dot(x_ref[...].astype(cdt), we_ref[...],
                            preferred_element_type=jnp.float32)

    @pl.when(k == pl.num_programs(1) - 1)
    def _():
        emb = acc_ref[...] + be_ref[...]
        # Probe matmuls are tiny; accumulation stays f32.  (With bf16 compute
        # dtype the activations are rounded to bf16 here — loosens tolerance.)
        h = jnp.dot(emb.astype(cdt), w1_ref[...],
                    preferred_element_type=jnp.float32)
        h = jnp.maximum(h + b1_ref[...], 0.0)
        out = jnp.dot(h.astype(cdt), w2_ref[...],
                      preferred_element_type=jnp.float32)
        o_ref[...] = (out + b2_ref[...]).astype(o_ref.dtype)


# --------------------------- one-time param prep -----------------------------
def prepare_fc_probe_params(we, be, w1, b1, w2, b2, *, compute_dtype=jnp.bfloat16):
    """Pad/cast parameters once (hoisted out of the per-call path)."""
    in_dim, E = we.shape
    Hd = w1.shape[1]
    C = w2.shape[1]
    IN_p = _round_up(in_dim, 128)
    E_p = _round_up(E, 128)
    H_p = _round_up(Hd, 128)
    C_p = _round_up(C, 128)

    def pad2(a, rows, cols, dtype):
        a2 = a.reshape((1, -1)) if a.ndim == 1 else a
        out = jnp.zeros((rows, cols), dtype)
        return out.at[: a2.shape[0], : a2.shape[1]].set(a2.astype(dtype))

    return {
        "we": pad2(we, IN_p, E_p, compute_dtype),
        "be": pad2(be, 1, E_p, jnp.float32),
        "w1": pad2(w1, E_p, H_p, compute_dtype),
        "b1": pad2(b1, 1, H_p, jnp.float32),
        "w2": pad2(w2, H_p, C_p, compute_dtype),
        "b2": pad2(b2, 1, C_p, jnp.float32),
        "dims": (in_dim, E, Hd, C, IN_p, E_p, H_p, C_p),
    }


# ------------------------------ forward wrapper ------------------------------
def fc_probe_forward(xs_nchw, params, *, tile_b: int = 512, tile_k: int = 2048,
                     vmem_budget_bytes: int | None = None):
    """FCProbe forward: flatten NCHW -> embedder Linear -> ReLU-MLP probe.

    All three matmuls run inside one Pallas kernel.  Returns (B, n_classes) f32.
    """
    in_dim, E, Hd, C, IN_p, E_p, H_p, C_p = params["dims"]
    we_p, be_p = params["we"], params["be"]
    w1_p, b1_p = params["w1"], params["b1"]
    w2_p, b2_p = params["w2"], params["b2"]

    B = xs_nchw.shape[0]
    assert math.prod(xs_nchw.shape[1:]) == in_dim
    x = xs_nchw.reshape(B, in_dim)

    cdt_isz = jnp.dtype(we_p.dtype).itemsize
    x_isz = jnp.dtype(x.dtype).itemsize
    sub = _sublane(x.dtype)

    # Only materialize a padded copy of x when actually needed (ragged K or a
    # batch smaller than one sublane group).  On the aligned fast path x is
    # handed to the kernel with zero extra HBM traffic.
    B_rows = _round_up(B, sub)
    if in_dim != IN_p or B_rows != B:
        x_pad = jnp.zeros((B_rows, IN_p), x.dtype)
        x = x_pad.at[:B, :in_dim].set(x)

    # --- VMEM budget & tile selection -------------------------------------
    if vmem_budget_bytes is None:
        try:
            phys = int(pltpu.get_tpu_info().vmem_capacity_bytes)
        except Exception:
            phys = 64 << 20            # conservative: v7x per-TC VMEM
        vmem_budget_bytes = int(phys * 0.75)

    # Balanced batch tiles (avoid a tiny ragged tail), rounded to a sublane group.
    n_bt = max(1, _cdiv(B_rows, max(sub, tile_b)))
    tb = _round_up(_cdiv(B_rows, n_bt), sub)

    def pick_tk(limit):
        t = min(max(128, (limit // 128) * 128), IN_p)
        while IN_p % t:            # tk must divide IN_p exactly (no garbage K cols)
            t -= 128
        return t

    def vmem_est(tb_, tk_):
        return (2 * tb_ * tk_ * x_isz                       # x double-buffer
                + 2 * tk_ * E_p * cdt_isz                   # we double-buffer
                + 2 * (E_p * H_p + H_p * C_p) * cdt_isz     # resident probe weights
                + 2 * (E_p + H_p + C_p) * 4                 # biases (f32)
                + 2 * tb_ * C_p * 4                         # out double-buffer
                + tb_ * E_p * 4)                            # f32 accumulator

    tk = pick_tk(tile_k)
    while vmem_est(tb, tk) > vmem_budget_bytes and tk > 128:
        tk = pick_tk(tk - 128)
    while vmem_est(tb, tk) > vmem_budget_bytes and tb > sub:
        tb = max(sub, _round_up(tb // 2, sub))

    n_bt = _cdiv(B_rows, tb)
    n_kt = IN_p // tk

    est = vmem_est(tb, tk)
    vmem_limit = int(min(vmem_budget_bytes + (8 << 20),
                         max(32 << 20, int(est * 1.3))))

    flops = 2 * B_rows * (IN_p * E_p + E_p * H_p + H_p * C_p)
    bytes_accessed = (B_rows * IN_p * x_isz
                      + n_bt * IN_p * E_p * cdt_isz
                      + (E_p * H_p + H_p * C_p) * cdt_isz
                      + (E_p + H_p + C_p) * 4
                      + B_rows * C_p * 4)

    # NOTE: if xprof shows exposed DMA on the x stream, add
    # pipeline_mode=pl.Buffered(3) to the x BlockSpec (extra tb*tk buffer).
    out_padded = pl.pallas_call(
        fc_probe_kernel,
        out_shape=jax.ShapeDtypeStruct((B_rows, C_p), jnp.float32),
        grid_spec=pltpu.PrefetchScalarGridSpec(
            num_scalar_prefetch=0,
            grid=(n_bt, n_kt),
            in_specs=[
                pl.BlockSpec((tb, tk), lambda i, k: (i, k)),      # x tile
                pl.BlockSpec((tk, E_p), lambda i, k: (k, 0)),     # we K-slice
                pl.BlockSpec((1, E_p), lambda i, k: (0, 0)),      # be (resident)
                pl.BlockSpec((E_p, H_p), lambda i, k: (0, 0)),    # w1 (resident)
                pl.BlockSpec((1, H_p), lambda i, k: (0, 0)),      # b1 (resident)
                pl.BlockSpec((H_p, C_p), lambda i, k: (0, 0)),    # w2 (resident)
                pl.BlockSpec((1, C_p), lambda i, k: (0, 0)),      # b2 (resident)
            ],
            out_specs=pl.BlockSpec((tb, C_p), lambda i, k: (i, 0)),
            scratch_shapes=[pltpu.VMEM((tb, E_p), jnp.float32)],
        ),
        compiler_params=pltpu.CompilerParams(
            dimension_semantics=("parallel", "arbitrary"),
            vmem_limit_bytes=vmem_limit,
        ),
        cost_estimate=pl.CostEstimate(
            flops=int(flops), transcendentals=0,
            bytes_accessed=int(bytes_accessed)),
    )(x, we_p, be_p, w1_p, b1_p, w2_p, b2_p)

    return out_padded[:B, :C]


# ------------------------------ glue / setup ---------------------------------
def make_params(key, in_dim, embed_dim, hidden_dim, n_classes):
    """Deterministic parameter init (PyTorch-Linear-style uniform bounds)."""
    ks = jax.random.split(key, 6)

    def linear_init(kw, kb, fan_in, fan_out):
        bound = 1.0 / jnp.sqrt(fan_in)
        w = jax.random.uniform(kw, (fan_in, fan_out), jnp.float32, -bound, bound)
        b = jax.random.uniform(kb, (1, fan_out), jnp.float32, -bound, bound)
        return w, b

    we, be = linear_init(ks[0], ks[1], in_dim, embed_dim)   # embedder projection
    w1, b1 = linear_init(ks[2], ks[3], embed_dim, hidden_dim)
    w2, b2 = linear_init(ks[4], ks[5], hidden_dim, n_classes)
    return (we, be), (w1, b1), (w2, b2)


if __name__ == "__main__":
    # Small shapes consistent with the module's forward:
    # xs: NCHW images; FCProbeConfig(n_layers=2), embed_dim=32, hidden=32, classes=10.
    B, C, H, W = 2, 4, 16, 16
    embed_dim, hidden_dim, n_classes = 32, 32, 10

    key = jax.random.PRNGKey(0)
    k_x, k_p = jax.random.split(key)
    xs = jax.random.normal(k_x, (B, C, H, W), dtype=jnp.float32)

    (we, be), (w1, b1), (w2, b2) = make_params(
        k_p, C * H * W, embed_dim, hidden_dim, n_classes
    )

    # f32 compute here so the reference check stays tight; use the bf16 default
    # in production (and loosen the tolerance accordingly).
    params = prepare_fc_probe_params(we, be, w1, b1, w2, b2,
                                     compute_dtype=jnp.float32)
    # tile_k=512 on in_dim=1024 -> 2 K steps, exercising the accumulator path.
    logits = fc_probe_forward(xs, params, tile_b=512, tile_k=512)
    logits = jax.block_until_ready(logits)

    # Plain-JAX reference for the full fused forward (f32).
    flat = xs.reshape(B, -1)
    emb = flat @ we + be
    ref = jnp.maximum(emb @ w1 + b1, 0.0) @ w2 + b2

    assert logits.shape == (B, n_classes)
    err = float(jnp.max(jnp.abs(logits - ref)))
    assert jnp.allclose(logits, ref, atol=1e-3, rtol=1e-3), f"max abs err {err}"

    print("KERNEL_OK")
</pallas_src>

<mosaic_0001>
module attributes {stable_mosaic.version = 11 : i64} {
  func.func @fc_probe_kernel(%arg0: i32, %arg1: i32, %arg2: memref<8x512xf32, #tpu.memory_space<vmem>>, %arg3: memref<512x128xf32, #tpu.memory_space<vmem>>, %arg4: memref<1x128xf32, #tpu.memory_space<vmem>>, %arg5: memref<128x128xf32, #tpu.memory_space<vmem>>, %arg6: memref<1x128xf32, #tpu.memory_space<vmem>>, %arg7: memref<128x128xf32, #tpu.memory_space<vmem>>, %arg8: memref<1x128xf32, #tpu.memory_space<vmem>>, %arg9: memref<8x128xf32, #tpu.memory_space<vmem>>, %arg10: memref<8x128xf32, #tpu.memory_space<vmem>>) attributes {dimension_semantics = [#tpu.dimension_semantics<parallel>, #tpu.dimension_semantics<arbitrary>], iteration_bounds = array<i64: 1, 2>, scalar_prefetch = 0 : i64, scratch_operands = 1 : i64, tpu.core_type = #tpu.core_type<tc>, window_params = [{transform_indices = @transform_0, window_bounds = array<i64: 8, 512>}, {transform_indices = @transform_1, window_bounds = array<i64: 512, 128>}, {pipeline_mode = #tpu.pipeline_mode<synchronous>, transform_indices = @transform_2, window_bounds = array<i64: 1, 128>}, {pipeline_mode = #tpu.pipeline_mode<synchronous>, transform_indices = @transform_3, window_bounds = array<i64: 128, 128>}, {pipeline_mode = #tpu.pipeline_mode<synchronous>, transform_indices = @transform_4, window_bounds = array<i64: 1, 128>}, {pipeline_mode = #tpu.pipeline_mode<synchronous>, transform_indices = @transform_5, window_bounds = array<i64: 128, 128>}, {pipeline_mode = #tpu.pipeline_mode<synchronous>, transform_indices = @transform_6, window_bounds = array<i64: 1, 128>}, {transform_indices = @transform_7, window_bounds = array<i64: 8, 128>}]} {
    %c0_i32 = arith.constant 0 : i32
    %0 = arith.cmpi eq, %arg1, %c0_i32 : i32
    %1 = arith.extui %0 : i1 to i32
    %c0_i32_0 = arith.constant 0 : i32
    %2 = arith.cmpi ne, %1, %c0_i32_0 : i32
    scf.if %2 {
      %cst_9 = arith.constant 0.000000e+00 : f32
      %12 = vector.broadcast %cst_9 : f32 to vector<8x128xf32>
      %c0_10 = arith.constant 0 : index
      %c0_11 = arith.constant 0 : index
      %13 = vector.load %arg10[%c0_10, %c0_11] : memref<8x128xf32, #tpu.memory_space<vmem>>, vector<8x128xf32>
      tpu.vector_store %arg10[%c0_10, %c0_11], %12 {strides = array<i32>} : memref<8x128xf32, #tpu.memory_space<vmem>>, vector<8x128xf32>,
    } else {
    }
    %c0 = arith.constant 0 : index
    %c0_1 = arith.constant 0 : index
    %3 = vector.load %arg10[%c0, %c0_1] : memref<8x128xf32, #tpu.memory_space<vmem>>, vector<8x128xf32>
    %c0_2 = arith.constant 0 : index
    %c0_3 = arith.constant 0 : index
    %4 = vector.load %arg2[%c0_2, %c0_3] : memref<8x512xf32, #tpu.memory_space<vmem>>, vector<8x512xf32>
    %c0_4 = arith.constant 0 : index
    %c0_5 = arith.constant 0 : index
    %5 = vector.load %arg3[%c0_4, %c0_5] : memref<512x128xf32, #tpu.memory_space<vmem>>, vector<512x128xf32>
    %cst = arith.constant dense<0.000000e+00> : vector<8x128xf32>
    %6 = tpu.matmul %4, %5, %cst {dimension_numbers = #tpu.dot_dimension_numbers<[1], [0], [0], [1], [0, 0, 1, 1], [], []>} : vector<8x512xf32>, vector<512x128xf32>, vector<8x128xf32> -> vector<8x128xf32>
    %7 = arith.addf %3, %6 : vector<8x128xf32>
    %c0_6 = arith.constant 0 : index
    %c0_7 = arith.constant 0 : index
    %8 = vector.load %arg10[%c0_6, %c0_7] : memref<8x128xf32, #tpu.memory_space<vmem>>, vector<8x128xf32>
    tpu.vector_store %arg10[%c0_6, %c0_7], %7 {strides = array<i32>} : memref<8x128xf32, #tpu.memory_space<vmem>>, vector<8x128xf32>,
    %c1_i32 = arith.constant 1 : i32
    %9 = arith.cmpi eq, %arg1, %c1_i32 : i32
    %10 = arith.extui %9 : i1 to i32
    %c0_i32_8 = arith.constant 0 : i32
    %11 = arith.cmpi ne, %10, %c0_i32_8 : i32
    scf.if %11 {
      %c0_9 = arith.constant 0 : index
      %c0_10 = arith.constant 0 : index
      %12 = vector.load %arg10[%c0_9, %c0_10] : memref<8x128xf32, #tpu.memory_space<vmem>>, vector<8x128xf32>
      %c0_11 = arith.constant 0 : index
      %c0_12 = arith.constant 0 : index
      %13 = vector.load %arg4[%c0_11, %c0_12] : memref<1x128xf32, #tpu.memory_space<vmem>>, vector<1x128xf32>
      %14 = vector.broadcast %13 : vector<1x128xf32> to vector<8x128xf32>
      %15 = arith.addf %12, %14 : vector<8x128xf32>
      %c0_13 = arith.constant 0 : index
      %c0_14 = arith.constant 0 : index
      %16 = vector.load %arg5[%c0_13, %c0_14] : memref<128x128xf32, #tpu.memory_space<vmem>>, vector<128x128xf32>
      %cst_15 = arith.constant dense<0.000000e+00> : vector<8x128xf32>
      %17 = tpu.matmul %15, %16, %cst_15 {dimension_numbers = #tpu.dot_dimension_numbers<[1], [0], [0], [1], [0, 0, 1, 1], [], []>} : vector<8x128xf32>, vector<128x128xf32>, vector<8x128xf32> -> vector<8x128xf32>
      %c0_16 = arith.constant 0 : index
      %c0_17 = arith.constant 0 : index
      %18 = vector.load %arg6[%c0_16, %c0_17] : memref<1x128xf32, #tpu.memory_space<vmem>>, vector<1x128xf32>
      %19 = vector.broadcast %18 : vector<1x128xf32> to vector<8x128xf32>
      %20 = arith.addf %17, %19 : vector<8x128xf32>
      %cst_18 = arith.constant 0.000000e+00 : f32
      %21 = vector.broadcast %cst_18 : f32 to vector<8x128xf32>
      %22 = arith.maximumf %20, %21 : vector<8x128xf32>
      %c0_19 = arith.constant 0 : index
      %c0_20 = arith.constant 0 : index
      %23 = vector.load %arg7[%c0_19, %c0_20] : memref<128x128xf32, #tpu.memory_space<vmem>>, vector<128x128xf32>
      %cst_21 = arith.constant dense<0.000000e+00> : vector<8x128xf32>
      %24 = tpu.matmul %22, %23, %cst_21 {dimension_numbers = #tpu.dot_dimension_numbers<[1], [0], [0], [1], [0, 0, 1, 1], [], []>} : vector<8x128xf32>, vector<128x128xf32>, vector<8x128xf32> -> vector<8x128xf32>
      %c0_22 = arith.constant 0 : index
      %c0_23 = arith.constant 0 : index
      %25 = vector.load %arg8[%c0_22, %c0_23] : memref<1x128xf32, #tpu.memory_space<vmem>>, vector<1x128xf32>
      %26 = vector.broadcast %25 : vector<1x128xf32> to vector<8x128xf32>
      %27 = arith.addf %24, %26 : vector<8x128xf32>
      %c0_24 = arith.constant 0 : index
      %c0_25 = arith.constant 0 : index
      %28 = vector.load %arg9[%c0_24, %c0_25] : memref<8x128xf32, #tpu.memory_space<vmem>>, vector<8x128xf32>
      tpu.vector_store %arg9[%c0_24, %c0_25], %27 {strides = array<i32>} : memref<8x128xf32, #tpu.memory_space<vmem>>, vector<8x128xf32>,
    } else {
    }
    return
  }
  func.func @transform_0(%arg0: i32, %arg1: i32) -> (i32, i32) {
    %c0_i32 = arith.constant 0 : i32
    return %arg0, %arg1 : i32, i32
  }
  func.func @transform_1(%arg0: i32, %arg1: i32) -> (i32, i32) {
    %c0_i32 = arith.constant 0 : i32
    %c0_i32_0 = arith.constant 0 : i32
    return %arg1, %c0_i32 : i32, i32
  }
  func.func @transform_2(%arg0: i32, %arg1: i32) -> (i32, i32) {
    %c0_i32 = arith.constant 0 : i32
    %c0_i32_0 = arith.constant 0 : i32
    %c0_i32_1 = arith.constant 0 : i32
    return %c0_i32, %c0_i32_0 : i32, i32
  }
  func.func @transform_3(%arg0: i32, %arg1: i32) -> (i32, i32) {
    %c0_i32 = arith.constant 0 : i32
    %c0_i32_0 = arith.constant 0 : i32
    %c0_i32_1 = arith.constant 0 : i32
    return %c0_i32, %c0_i32_0 : i32, i32
  }
  func.func @transform_4(%arg0: i32, %arg1: i32) -> (i32, i32) {
    %c0_i32 = arith.constant 0 : i32
    %c0_i32_0 = arith.constant 0 : i32
    %c0_i32_1 = arith.constant 0 : i32
    return %c0_i32, %c0_i32_0 : i32, i32
  }
  func.func @transform_5(%arg0: i32, %arg1: i32) -> (i32, i32) {
    %c0_i32 = arith.constant 0 : i32
    %c0_i32_0 = arith.constant 0 : i32
    %c0_i32_1 = arith.constant 0 : i32
    return %c0_i32, %c0_i32_0 : i32, i32
  }
  func.func @transform_6(%arg0: i32, %arg1: i32) -> (i32, i32) {
    %c0_i32 = arith.constant 0 : i32
    %c0_i32_0 = arith.constant 0 : i32
    %c0_i32_1 = arith.constant 0 : i32
    return %c0_i32, %c0_i32_0 : i32, i32
  }
  func.func @transform_7(%arg0: i32, %arg1: i32) -> (i32, i32) {
    %c0_i32 = arith.constant 0 : i32
    %c0_i32_0 = arith.constant 0 : i32
    return %arg0, %c0_i32 : i32, i32
  }
}

</mosaic_0001>

<bundles_post_ra>
// kernel: tpu_custom_call.1
= control target key start
LH: loop header
LB: loop body
LE: loop exit
PB: predicated region body
PF: predicated region fallthrough
CT: control target
= control target key end

     0   :  { %s1349_s0 = inlined_call_operand.hbm [shape: f32[8,1024], index: 0, kind: input, shape index: {}]   ;;  %s1350_s1 = inlined_call_operand.hbm [shape: f32[1024,128], index: 1, kind: input, shape index: {}]   ;;  %s1351_s2 = inlined_call_operand.vmem [shape: f32[1,128], index: 2, kind: input, shape index: {}]   ;;  %s1352_s3 = inlined_call_operand.hbm [shape: f32[128,128], index: 3, kind: input, shape index: {}]   ;;  %s1353_s4 = inlined_call_operand.vmem [shape: f32[1,128], index: 4, kind: input, shape index: {}]   ;;  %s1354_s5 = inlined_call_operand.hbm [shape: f32[128,128], index: 5, kind: input, shape index: {}]   ;;  %s1355_s6 = inlined_call_operand.vmem [shape: f32[1,128], index: 6, kind: input, shape index: {}]   ;;  %s1356_s7 = inlined_call_operand.hbm [shape: f32[8,128], index: 7, kind: output, shape index: {}]  }
   0x1   :  { %1361 = sst [smem:[#allocation20_spill]] %s1352_s3 }
   0x2   :  { %1362 = sst [smem:[#allocation21_spill]] %s1354_s5 }
   0x3   :  { %12 = vsyncpa [#allocation4], 0 }
   0x4   :  { %14 = vsyncpa [#allocation4 + $0x1], 0 }
   0x5   :  { %15 = vsyncpa [#allocation7], 0 }
   0x6   :  { %17 = vsyncpa [#allocation7 + $0x1], 0 }
   0x7   :  { %18 = vsyncpa [#allocation10], 0 }
   0x8   :  { %19 = vsyncpa [#allocation5], 0  ;;  %s1128_s24 = smov 0   ;;  %s1130_s25 = smov 0  }
   0x9   :  { %s1132_s26 = smov 0   ;;  %s1134_s27 = smov 0  }
   0xa   :  { %s1136_s28 = smov 0   ;;  %s1138_s29 = smov 0  }
   0xb LB: > { %1363 = sst [smem:[#allocation17_spill]] %s1068_s26  ;;  %s1159_s30 = sadd.s32 4294967295, %s1080_s29   ;;  %s1080_s29 = sphi %s1138_s29, %s25_s29   ;;  %s1076_s28 = sphi %s1136_s28, %s1379_s28   ;;  %s1072_s27 = sphi %s1134_s27, %s1378_s27   ;;  %s1068_s26 = sphi %s1132_s26, %s1374_s26   ;;  %s1064_s25 = sphi %s1130_s25, %s1377_s25   ;;  %s1060_s24 = sphi %s1128_s24, %s1376_s24  }
   0xc   : > { %p749_p0 = scmp.ge.s32.totalorder %s1080_s29, 1  ;;  %p60_p1 = scmp.eq.s32.totalorder %s1159_s30, 0 }
   0xd   : > { %p227_p2 = scmp.lt.s32.totalorder %s1080_s29, 3  ;;  %s1364_s3 = sld [smem:[#allocation20_spill]] }
   0xe   : > { %s1082_s12 = smov [#allocation8]   ;;  %s1366_s5 = sld [smem:[#allocation21_spill]] }
   0xf   : > { %p1167_p3 = pnand %p749_p0, %p227_p2  ;;  %s243_s13 = sshll.u32 %s1082_s12, 4  ;;  %s244_s13 = int_to_ptr.vmem [resolvable:$true] %s243_s13 }
  0x10   : > { %s1357_s17 = smov 128   ;;  %s1358_s18 = smov 8  }
  0x11   : > { %p788_p4 = pneg %p1167_p3  ;;  %s1085_s19 = smov [#allocation9]  }
  0x12   : > { %s260_s20 = sshll.u32 %s1085_s19, 4  ;;  %s34_s21 = sadd.s32 1, %s1076_s28  ;;  %s261_s20 = int_to_ptr.vmem [resolvable:$true] %s260_s20 }
  0x13   : > { %s241_s10 = sshll.u32 %s1364_s3, 4  ;;  %p789_p5 = pnand %p788_p4, %p60_p1  ;;  %s242_s10 = int_to_ptr.hbm [resolvable:$true] %s241_s10 }
  0x14   : > { %s258_s16 = sshll.u32 %s1366_s5, 4  ;;  %s46_s22 = sadd.s32 1, %s1068_s26  ;;  %s259_s16 = int_to_ptr.hbm [resolvable:$true] %s258_s16 }
  0x15   : > { %791 = dma.hbm_to_vmem [thread:$0]  (!%p789_p5), %s242_s10, 2048, %s244_s13, [#allocation7], %s1357_s17, %s1357_s17, %s1358_s18  }
  0x16   : > { %794 = dma.hbm_to_vmem [thread:$0]  (!%p789_p5), %s259_s16, 2048, %s261_s20, [#allocation10], %s1357_s17, %s1357_s17, %s1358_s18  }
  0x17   : > { %p35_p6 = scmp.ge.s32.totalorder %s34_s21, 2  ;;  %p53_p7 = scmp.ne.s32.totalorder %s1068_s26, %s1064_s25 }
  0x18   : > { %p54_p8 = scmp.eq.s32.totalorder %s1080_s29, 0  ;;  %p59_p9 = scmp.ne.s32.totalorder %s1064_s25, %s1060_s24 }
  0x19   : > { %s1381_s21 = smov (%p35_p6, %s34_s21), 0  ;;  %p804_p12 = scmp.lt.s32.totalorder %s1080_s29, 2 }
  0x1a   : > { %1367 = sst [smem:[#allocation18_spill]] %s1381_s21  ;;  %p1193_p10 = por %p54_p8, %p53_p7 }
  0x1b   : > { %p1199_p11 = por %p60_p1, %p59_p9  ;;  %s42_s9 = ssub.s32 %s1076_s28, %s1381_s21 }
  0x1c   : > { %p44_p13 = scmp.eq.s32.totalorder %s42_s9, 0  ;;  %s277_s10 = sand.u32 1, %s1068_s26  }
  0x1d   : > { %s753_s12 = sshll.u32 %s277_s10, 5  ;;  %s770_s13 = sshll.u32 %s1076_s28, 5 }
  0x1e   : > { %s1208_s24 = scalar_select %p44_p13, %s1068_s26, %s46_s22  }
  0x1f   : > { %s288_s16 = scalar_lea.hbm %s1349_s0, %s770_s13  ;;  %s281_s19 = scalar_lea.vmem [#allocation3], %s753_s12 }
  0x20   : > { %1370 = sst [smem:[#allocation19_spill]] %s1208_s24  ;;  %s292_s20 = sshll.u32 %s281_s19, 4  ;;  %s293_s20 = int_to_ptr.vmem [resolvable:$true] %s292_s20 }
  0x21   : > { %s290_s17 = sshll.u32 %s288_s16, 4  ;;  %p796_p0 = pnand %p804_p12, %p1193_p10  ;;  %s291_s17 = int_to_ptr.hbm [resolvable:$true] %s290_s17 }
  0x22   : > { %s756_s18 = sshll.u32 %s277_s10, 9  ;;  %s771_s3 = sshll.u32 %s1076_s28, 9 }
  0x23   : > { %s278_s9 = scalar_lea.sflag [#allocation4], %s277_s10  ;;  %s303_s5 = scalar_lea.vmem [#allocation6], %s756_s18 }
  0x24   : > { %798 = dma.hbm_to_vmem [thread:$0]  (!%p796_p0), %s291_s17, 512, %s293_s20, %s278_s9  }
  0x25   : > { %s311_s21 = sshll.u32 %s303_s5, 4  ;;  %s299_s22 = sand.u32 1, %s1080_s29   ;;  %s312_s21 = int_to_ptr.vmem [resolvable:$true] %s311_s21 }
  0x26   : > { %s308_s14 = scalar_lea.hbm %s1350_s1, %s771_s3  ;;  %s300_s12 = scalar_lea.sflag [#allocation7], %s299_s22 }
  0x27   : > { %s309_s13 = sshll.u32 %s308_s14, 4  ;;  %s1371_s15 = smov 8   ;;  %s310_s13 = int_to_ptr.hbm [resolvable:$true] %s309_s13 }
  0x28   : > { %s1372_s16 = smov 128   ;;  %323 = sbr.rel (%p1167_p3) target bundleno = 531 (0x213), region = 48 }
  0x29   : > { %801 = dma.hbm_to_vmem [thread:$0]  (!%p796_p0), %s310_s13, 8192, %s312_s21, %s300_s12, %s1372_s16, %s1372_s16, %s1371_s15  }
  0x2a   : > { %s325_s17 = sand.u32 (!%p1167_p3), 1, %s1064_s25  }
  0x2b   : > { %s760_s5 = sshll.u32 (!%p1167_p3), %s325_s17, 5  ;;  %s326_s18 = scalar_lea.sflag (!%p1167_p3), [#allocation4], %s325_s17 }
  0x2c   : > { %s1227_s23 = scalar_lea.vmem (!%p1167_p3), [#allocation3], %s760_s5 }
  0x2d   : > { %1039 = dma.done.wait (%p1199_p11), %s326_s18, 512  }
  0x2e   : > { %1041 = vsyncadd (%p1199_p11), %s326_s18, 4294966784  ;;  %s335_s3 = sand.u32 1, %s1159_s30   ;;  %s761_s26 = sshll.u32 %s325_s17, 9 }
  0x2f   : > { %s336_s21 = scalar_lea.sflag [#allocation7], %s335_s3  ;;  %s1234_s10 = scalar_lea.vmem [#allocation6], %s761_s26 }
  0x30   : > { %1043 = dma.done.wait (%p1199_p11), %s336_s21, 8192  }
  0x31   : > { %1045 = vsyncadd (%p1199_p11), %s336_s21, 4294959104 }
  0x32   : > { %1047 = dma.done.wait (%p60_p1), [#allocation7], 2048  }
  0x33   : > { %1049 = vsyncadd (%p60_p1), [#allocation7], 4294965248 }
  0x34   : > { %1051 = dma.done.wait (%p60_p1), [#allocation10], 2048  }
  0x35   : > { %1053 = vsyncadd (%p60_p1), [#allocation10], 4294965248  ;;  %p764_p2 = scmp.ne.s32.totalorder %s1072_s27, 0 }
  0x37   : > { %386 = sbr.rel (%p764_p2) target bundleno = 62 (0x3e), region = 68 }
  0x3c   : > { %v1086_v0 = vmov 0.0  }
  0x3d   : > { %387 = vst [vmem:[#allocation2] sm:$0xff] %v1086_v0 }
  0x3e PF: > { %v440_v1 = vld [vmem:[%s1234_s10 + $0x178] sm:$0xff]  ;;  %v439_v2 = vld [vmem:[%s1234_s10 + $0x170] sm:$0xff]  ;;  %v438_v6 = vld [vmem:[%s1234_s10 + $0x168] sm:$0xff]  ;;  %p765_p1 = scmp.ne.s32.totalorder %s1072_s27, 1 }
  0x3f   : > { %v456_v3 = vld [vmem:[%s1234_s10 + $0x1f8] sm:$0xff]  ;;  %497 = vmatpush.msra.mxu2 %v440_v1  ;;  %v455_v7 = vld [vmem:[%s1234_s10 + $0x1f0] sm:$0xff]  ;;  %v454_v10 = vld [vmem:[%s1234_s10 + $0x1e8] sm:$0xff] }
  0x40   : > { %517 = vmatpush.msra.mxu3 %v456_v3  ;;  %v408_v4 = vld [vmem:[%s1234_s10 + $0x78] sm:$0xff]  ;;  %v407_v8 = vld [vmem:[%s1234_s10 + $0x70] sm:$0xff]  ;;  %v406_v11 = vld [vmem:[%s1234_s10 + $0x68] sm:$0xff] }
  0x41   : > { %v424_v5 = vld [vmem:[%s1234_s10 + $0xf8] sm:$0xff]  ;;  %457 = vmatpush.msra.mxu0 %v408_v4  ;;  %v423_v9 = vld [vmem:[%s1234_s10 + $0xf0] sm:$0xff]  ;;  %498 = vmatpush.msra.mxu2 %v439_v2  ;;  %v437_v12 = vld [vmem:[%s1234_s10 + $0x160] sm:$0xff] }
  0x42   : > { %477 = vmatpush.msra.mxu1 %v424_v5  ;;  %518 = vmatpush.msra.mxu3 %v455_v7  ;;  %v422_v13 = vld [vmem:[%s1234_s10 + $0xe8] sm:$0xff]  ;;  %v453_v14 = vld [vmem:[%s1234_s10 + $0x1e0] sm:$0xff]  ;;  %v436_v17 = vld [vmem:[%s1234_s10 + $0x158] sm:$0xff] }
  0x43   : > { %458 = vmatpush.msra.mxu0 %v407_v8  ;;  %499 = vmatpush.msra.mxu2 %v438_v6  ;;  %v405_v15 = vld [vmem:[%s1234_s10 + $0x60] sm:$0xff]  ;;  %v452_v18 = vld [vmem:[%s1234_s10 + $0x1d8] sm:$0xff]  ;;  %v435_v21 = vld [vmem:[%s1234_s10 + $0x150] sm:$0xff] }
  0x44   : > { %478 = vmatpush.msra.mxu1 %v423_v9  ;;  %519 = vmatpush.msra.mxu3 %v454_v10  ;;  %v421_v16 = vld [vmem:[%s1234_s10 + $0xe0] sm:$0xff]  ;;  %v404_v19 = vld [vmem:[%s1234_s10 + $0x58] sm:$0xff]  ;;  %v451_v22 = vld [vmem:[%s1234_s10 + $0x1d0] sm:$0xff] }
  0x45   : > { %459 = vmatpush.msra.mxu0 %v406_v11  ;;  %500 = vmatpush.msra.mxu2 %v437_v12  ;;  %v420_v20 = vld [vmem:[%s1234_s10 + $0xd8] sm:$0xff]  ;;  %v403_v23 = vld [vmem:[%s1234_s10 + $0x50] sm:$0xff]  ;;  %v434_v25 = vld [vmem:[%s1234_s10 + $0x148] sm:$0xff] }
  0x46   : > { %479 = vmatpush.msra.mxu1 %v422_v13  ;;  %520 = vmatpush.msra.mxu3 %v453_v14  ;;  %v419_v24 = vld [vmem:[%s1234_s10 + $0xd0] sm:$0xff]  ;;  %v450_v26 = vld [vmem:[%s1234_s10 + $0x1c8] sm:$0xff]  ;;  %v433_v29 = vld [vmem:[%s1234_s10 + $0x140] sm:$0xff] }
  0x47   : > { %460 = vmatpush.msra.mxu0 %v405_v15  ;;  %501 = vmatpush.msra.mxu2 %v436_v17  ;;  %v402_v27 = vld [vmem:[%s1234_s10 + $0x48] sm:$0xff]  ;;  %v449_v30 = vld [vmem:[%s1234_s10 + $0x1c0] sm:$0xff]  ;;  %v432_v33 = vld [vmem:[%s1234_s10 + $0x138] sm:$0xff] }
  0x48   : > { %480 = vmatpush.msra.mxu1 %v421_v16  ;;  %521 = vmatpush.msra.mxu3 %v452_v18  ;;  %v418_v28 = vld [vmem:[%s1234_s10 + $0xc8] sm:$0xff]  ;;  %v401_v31 = vld [vmem:[%s1234_s10 + $0x40] sm:$0xff]  ;;  %v448_v34 = vld [vmem:[%s1234_s10 + $0x1b8] sm:$0xff] }
  0x49   : > { %461 = vmatpush.msra.mxu0 %v404_v19  ;;  %502 = vmatpush.msra.mxu2 %v435_v21  ;;  %v417_v32 = vld [vmem:[%s1234_s10 + $0xc0] sm:$0xff]  ;;  %v400_v35 = vld [vmem:[%s1234_s10 + $0x38] sm:$0xff]  ;;  %v431_v37 = vld [vmem:[%s1234_s10 + $0x130] sm:$0xff] }
  0x4a   : > { %481 = vmatpush.msra.mxu1 %v420_v20  ;;  %522 = vmatpush.msra.mxu3 %v451_v22  ;;  %v416_v36 = vld [vmem:[%s1234_s10 + $0xb8] sm:$0xff]  ;;  %v447_v38 = vld [vmem:[%s1234_s10 + $0x1b0] sm:$0xff]  ;;  %v430_v41 = vld [vmem:[%s1234_s10 + $0x128] sm:$0xff] }
  0x4b   : > { %462 = vmatpush.msra.mxu0 %v403_v23  ;;  %503 = vmatpush.msra.mxu2 %v434_v25  ;;  %v399_v39 = vld [vmem:[%s1234_s10 + $0x30] sm:$0xff]  ;;  %v446_v42 = vld [vmem:[%s1234_s10 + $0x1a8] sm:$0xff]  ;;  %v429_v45 = vld [vmem:[%s1234_s10 + $0x120] sm:$0xff] }
  0x4c   : > { %482 = vmatpush.msra.mxu1 %v419_v24  ;;  %523 = vmatpush.msra.mxu3 %v450_v26  ;;  %v415_v40 = vld [vmem:[%s1234_s10 + $0xb0] sm:$0xff]  ;;  %v398_v43 = vld [vmem:[%s1234_s10 + $0x28] sm:$0xff]  ;;  %v445_v46 = vld [vmem:[%s1234_s10 + $0x1a0] sm:$0xff] }
  0x4d   : > { %463 = vmatpush.msra.mxu0 %v402_v27  ;;  %504 = vmatpush.msra.mxu2 %v433_v29  ;;  %v414_v44 = vld [vmem:[%s1234_s10 + $0xa8] sm:$0xff]  ;;  %v397_v47 = vld [vmem:[%s1234_s10 + $0x20] sm:$0xff]  ;;  %v428_v49 = vld [vmem:[%s1234_s10 + $0x118] sm:$0xff] }
  0x4e   : > { %483 = vmatpush.msra.mxu1 %v418_v28  ;;  %524 = vmatpush.msra.mxu3 %v449_v30  ;;  %v413_v48 = vld [vmem:[%s1234_s10 + $0xa0] sm:$0xff]  ;;  %v444_v50 = vld [vmem:[%s1234_s10 + $0x198] sm:$0xff]  ;;  %v427_v53 = vld [vmem:[%s1234_s10 + $0x110] sm:$0xff] }
  0x4f   : > { %464 = vmatpush.msra.mxu0 %v401_v31  ;;  %505 = vmatpush.msra.mxu2 %v432_v33  ;;  %v396_v51 = vld [vmem:[%s1234_s10 + $0x18] sm:$0xff]  ;;  %v443_v54 = vld [vmem:[%s1234_s10 + $0x190] sm:$0xff]  ;;  %v426_v57 = vld [vmem:[%s1234_s10 + $0x108] sm:$0xff] }
  0x50   : > { %484 = vmatpush.msra.mxu1 %v417_v32  ;;  %525 = vmatpush.msra.mxu3 %v448_v34  ;;  %v412_v52 = vld [vmem:[%s1234_s10 + $0x98] sm:$0xff]  ;;  %v395_v55 = vld [vmem:[%s1234_s10 + $0x10] sm:$0xff]  ;;  %v442_v58 = vld [vmem:[%s1234_s10 + $0x188] sm:$0xff] }
  0x51   : > { %465 = vmatpush.msra.mxu0 %v400_v35  ;;  %506 = vmatpush.msra.mxu2 %v431_v37  ;;  %v411_v56 = vld [vmem:[%s1234_s10 + $0x90] sm:$0xff]  ;;  %v394_v59 = vld [vmem:[%s1234_s10 + $0x8] sm:$0xff]  ;;  %v425_v61 = vld [vmem:[%s1234_s10 + $0x100] sm:$0xff] }
  0x52   : > { %485 = vmatpush.msra.mxu1 %v416_v36  ;;  %526 = vmatpush.msra.mxu3 %v447_v38  ;;  %v410_v60 = vld [vmem:[%s1234_s10 + $0x88] sm:$0xff]  ;;  %v441_v62 = vld [vmem:[%s1234_s10 + $0x180] sm:$0xff]  ;;  %v391_v63 = vld [vmem:[%s1227_s23 + $0x10] sm:$0xff] }
  0x53   : > { %466 = vmatpush.msra.mxu0 %v399_v39  ;;  %507 = vmatpush.msra.mxu2 %v430_v41  ;;  %v392_v0 = vld [vmem:[%s1227_s23 + $0x18] sm:$0xff]  ;;  %v393_v1 = vld [vmem:[%s1234_s10] sm:$0xff]  ;;  %v390_v4 = vld [vmem:[%s1227_s23 + $0x8] sm:$0xff] }
  0x54   : > { %486 = vmatpush.msra.mxu1 %v415_v40  ;;  %527 = vmatpush.msra.mxu3 %v446_v42  ;;  %v409_v2 = vld [vmem:[%s1234_s10 + $0x80] sm:$0xff]  ;;  %v388_v11 = vld [vmem:[#allocation2] sm:$0xff] }
  0x55   : > { %467 = vmatpush.msra.mxu0 %v398_v43  ;;  %508 = vmatpush.msra.mxu2 %v429_v45  ;;  %v389_v3 = vld [vmem:[%s1227_s23] sm:$0xff] }
  0x56   : > { %487 = vmatpush.msra.mxu1 %v414_v44  ;;  %528 = vmatpush.msra.mxu3 %v445_v46 }
  0x57   : > { %468 = vmatpush.msra.mxu0 %v397_v47  ;;  %509 = vmatpush.msra.mxu2 %v428_v49 }
  0x58   : > { %488 = vmatpush.msra.mxu1 %v413_v48  ;;  %529 = vmatpush.msra.mxu3 %v444_v50 }
  0x59   : > { %469 = vmatpush.msra.mxu0 %v396_v51  ;;  %510 = vmatpush.msra.mxu2 %v427_v53 }
  0x5a   : > { %489 = vmatpush.msra.mxu1 %v412_v52  ;;  %530 = vmatpush.msra.mxu3 %v443_v54 }
  0x5b   : > { %470 = vmatpush.msra.mxu0 %v395_v55  ;;  %511 = vmatpush.msra.mxu2 %v426_v57 }
  0x5c   : > { %490 = vmatpush.msra.mxu1 %v411_v56  ;;  %531 = vmatpush.msra.mxu3 %v442_v58 }
  0x5d   : > { %471 = vmatpush.msra.mxu0 %v394_v59  ;;  %512 = vmatpush.msra.mxu2 %v425_v61 }
  0x5e   : > { %491 = vmatpush.msra.mxu1 %v410_v60  ;;  %532 = vmatpush.msra.mxu3 %v441_v62 }
  0x5f   : > { %513 = vmatmul.f32.vlgmr.msra.gmra.mxu2 %v391_v63  ;;  %533 = vmatmul.f32.vlgmr.msra.gmra.mxu3 %v392_v0 }
  0x60   : > { %472 = vmatpush.msra.mxu0 %v393_v1  ;;  %492 = vmatpush.msra.mxu1 %v409_v2 }
  0x61   : > { %473 = vmatmul.f32.vlgmr.msra.gmra.mxu0 %v389_v3  ;;  %493 = vmatmul.f32.vlgmr.msra.gmra.mxu1 %v390_v4 }
  0xde   : > { %v474_v5 = vpop.f32.mrf.mxu0  ;;  %v494_v6 = vpop.f32.mrf.mxu1 }
  0xdf   : > { %v495_v7 = vadd.f32 %v494_v6, %v474_v5 }
  0xe2   : > { %v514_v8 = vpop.f32.mrf.mxu2  ;;  %v534_v9 = vpop.f32.mrf.mxu3 }
  0xe3   : > { %v515_v10 = vadd.f32 %v514_v8, %v495_v7 }
  0xe5   : > { %v535_v12 = vadd.f32 %v534_v9, %v515_v10  ;;  %542 = sbr.rel (%p765_p1) target bundleno = 525 (0x20d), region = 72 }
  0xe7   : > { %v537_v13 = vadd.f32 %v535_v12, %v388_v11 }
  0xe9   : > { %538 = vst [vmem:[#allocation2] sm:$0xff] %v537_v13 }
  0xea   : > { %v564_v14 = vld [vmem:[#allocation8 + $0x78] sm:$0xff]  ;;  %v563_v15 = vld [vmem:[#allocation8 + $0x70] sm:$0xff]  ;;  %v562_v16 = vld [vmem:[#allocation8 + $0x68] sm:$0xff] }
  0xeb   : > { %569 = vmatpush.msra.mxu0 %v564_v14  ;;  %v561_v17 = vld [vmem:[#allocation8 + $0x60] sm:$0xff]  ;;  %v560_v18 = vld [vmem:[#allocation8 + $0x58] sm:$0xff]  ;;  %v604_v20 = vld [vmem:[#allocation9 + $0x70] sm:$0xff] }
  0xec   : > { %v605_v19 = vld [vmem:[#allocation9 + $0x78] sm:$0xff]  ;;  %v559_v21 = vld [vmem:[#allocation8 + $0x50] sm:$0xff]  ;;  %v603_v22 = vld [vmem:[#allocation9 + $0x68] sm:$0xff] }
  0xed   : > { %570 = vmatpush.msra.mxu0 %v563_v15  ;;  %610 = vmatpush.msra.mxu1 %v605_v19  ;;  %v558_v23 = vld [vmem:[#allocation8 + $0x48] sm:$0xff]  ;;  %v602_v24 = vld [vmem:[#allocation9 + $0x60] sm:$0xff]  ;;  %v601_v26 = vld [vmem:[#allocation9 + $0x58] sm:$0xff] }
  0xee   : > { %v557_v25 = vld [vmem:[#allocation8 + $0x40] sm:$0xff]  ;;  %v556_v27 = vld [vmem:[#allocation8 + $0x38] sm:$0xff]  ;;  %v600_v28 = vld [vmem:[#allocation9 + $0x50] sm:$0xff] }
  0xef   : > { %571 = vmatpush.msra.mxu0 %v562_v16  ;;  %611 = vmatpush.msra.mxu1 %v604_v20  ;;  %v555_v29 = vld [vmem:[#allocation8 + $0x30] sm:$0xff]  ;;  %v599_v30 = vld [vmem:[#allocation9 + $0x48] sm:$0xff]  ;;  %v598_v32 = vld [vmem:[#allocation9 + $0x40] sm:$0xff] }
  0xf0   : > { %v554_v31 = vld [vmem:[#allocation8 + $0x28] sm:$0xff]  ;;  %v553_v33 = vld [vmem:[#allocation8 + $0x20] sm:$0xff]  ;;  %v597_v34 = vld [vmem:[#allocation9 + $0x38] sm:$0xff] }
  0xf1   : > { %572 = vmatpush.msra.mxu0 %v561_v17  ;;  %612 = vmatpush.msra.mxu1 %v603_v22  ;;  %v552_v35 = vld [vmem:[#allocation8 + $0x18] sm:$0xff]  ;;  %v596_v36 = vld [vmem:[#allocation9 + $0x30] sm:$0xff]  ;;  %v595_v39 = vld [vmem:[#allocation9 + $0x28] sm:$0xff] }
  0xf2   : > { %v551_v37 = vld [vmem:[#allocation8 + $0x10] sm:$0xff]  ;;  %v863_v38 = vld [vmem:[%s1351_s2] ss:$0 sm:$0xff]  ;;  %v550_v41 = vld [vmem:[#allocation8 + $0x8] sm:$0xff] }
  0xf3   : > { %573 = vmatpush.msra.mxu0 %v560_v18  ;;  %613 = vmatpush.msra.mxu1 %v602_v24  ;;  %v543_v40 = vld [vmem:[#allocation2] sm:$0xff]  ;;  %v594_v42 = vld [vmem:[#allocation9 + $0x20] sm:$0xff]  ;;  %v592_v46 = vld [vmem:[#allocation9 + $0x10] sm:$0xff] }
  0xf4   : > { %v549_v43 = vld [vmem:[#allocation8] sm:$0xff]  ;;  %v548_v44 = vadd.f32 %v863_v38, %v543_v40  ;;  %v593_v45 = vld [vmem:[#allocation9 + $0x18] sm:$0xff]  ;;  %v591_v47 = vld [vmem:[#allocation9 + $0x8] sm:$0xff] }
  0xf5   : > { %574 = vmatpush.msra.mxu0 %v559_v21  ;;  %614 = vmatpush.msra.mxu1 %v601_v26  ;;  %v590_v48 = vld [vmem:[#allocation9] sm:$0xff]  ;;  %v864_v49 = vld [vmem:[%s1353_s4] ss:$0 sm:$0xff] }
  0xf6   : > { %v865_v53 = vld [vmem:[%s1355_s6] ss:$0 sm:$0xff] }
  0xf7   : > { %575 = vmatpush.msra.mxu0 %v558_v23  ;;  %615 = vmatpush.msra.mxu1 %v600_v28 }
  0xf9   : > { %576 = vmatpush.msra.mxu0 %v557_v25  ;;  %616 = vmatpush.msra.mxu1 %v599_v30 }
  0xfb   : > { %577 = vmatpush.msra.mxu0 %v556_v27  ;;  %617 = vmatpush.msra.mxu1 %v598_v32 }
  0xfd   : > { %578 = vmatpush.msra.mxu0 %v555_v29  ;;  %618 = vmatpush.msra.mxu1 %v597_v34 }
  0xff   : > { %579 = vmatpush.msra.mxu0 %v554_v31  ;;  %619 = vmatpush.msra.mxu1 %v596_v36 }
 0x101   : > { %580 = vmatpush.msra.mxu0 %v553_v33  ;;  %620 = vmatpush.msra.mxu1 %v595_v39 }
 0x103   : > { %581 = vmatpush.msra.mxu0 %v552_v35  ;;  %621 = vmatpush.msra.mxu1 %v594_v42 }
 0x105   : > { %582 = vmatpush.msra.mxu0 %v551_v37  ;;  %622 = vmatpush.msra.mxu1 %v593_v45 }
 0x107   : > { %583 = vmatpush.msra.mxu0 %v550_v41  ;;  %623 = vmatpush.msra.mxu1 %v592_v46 }
 0x109   : > { %584 = vmatpush.msra.mxu0 %v549_v43  ;;  %624 = vmatpush.msra.mxu1 %v591_v47 }
 0x10a   : > { %585 = vmatmul.f32.vlgmr.msra.gmra.mxu0 %v548_v44 }
 0x10b   : > { %625 = vmatpush.msra.mxu1 %v590_v48 }
 0x187   : > { %v586_v50 = vpop.f32.mrf.mxu0 }
 0x188   : > { %v587_v51 = vadd.f32 %v864_v49, %v586_v50 }
 0x18a   : > { %v589_v52 = vmax.f32 %v587_v51, 0.0 }
 0x18c   : > { %626 = vmatmul.f32.vlgmr.msra.gmra.mxu1 %v589_v52 }
 0x209   : > { %v627_v54 = vpop.f32.mrf.mxu1 }
 0x20a   : > { %v628_v55 = vadd.f32 %v865_v53, %v627_v54 }
 0x20c   : > { %630 = vst [vmem:[#allocation11] sm:$0xff] %v628_v55 }
 0x20d PF: > { %p807_p3 = scmp.eq.s32.totalorder %s1159_s30, 1  ;;  %s641_s14 = sshll.u32 %s1356_s7, 4  ;;  %s642_s14 = int_to_ptr.hbm [resolvable:$true] %s641_s14 }
 0x20e   : > { %s1087_s13 = smov [#allocation11]  }
 0x20f   : > { %s639_s12 = sshll.u32 %s1087_s13, 4  ;;  %s640_s12 = int_to_ptr.vmem [resolvable:$true] %s639_s12 }
 0x210   : > { %785 = dma.vmem_to_hbm [thread:$0]  (%p807_p3), %s640_s12, 128, %s642_s14, [#allocation5]  }
 0x211   : > { %1055 = dma.done.wait (%p807_p3), [#allocation5], 128  }
 0x212   : > { %1057 = vsyncadd (%p807_p3), [#allocation5], 4294967168 }
 0x213 PF: > { %s25_s29 = sadd.s32 1, %s1080_s29   ;;  %s1373_s15 = sld [smem:[#allocation17_spill]] }
 0x214   : > { %p22_p4 = scmp.ge.s32.totalorder %s25_s29, 4   ;;  %s1374_s26 = sld [smem:[#allocation19_spill]] }
 0x215   : > { %s1375_s30 = sld [smem:[#allocation18_spill]]  ;;  %s1376_s24 = smov %s1064_s25 }
 0x216   : > { %s1378_s27 = smov %s1076_s28 }
 0x217   :  { %24 = sbr.rel (!%p22_p4) target bundleno = 11 (0xb), region = 115 }
 0x219   : > { %s1377_s25 = smov %s1373_s15 }
 0x21b   : > { %s1379_s28 = smov %s1375_s30 }
 0x21c   :  { %655 = vsyncpa [#allocation4], 1 }
 0x21d   :  { %657 = vsyncpa [#allocation4 + $0x1], 1 }
 0x21e   :  { %658 = vsyncpa [#allocation7], 1 }
 0x21f   :  { %660 = vsyncpa [#allocation7 + $0x1], 1 }
 0x220   :  { %661 = vsyncpa [#allocation10], 1 }
 0x221   :  { %662 = vsyncpa [#allocation5], 1 }
 0x222   :  { %664 = vsyncpa [#allocation5 + $0x1], 1 }

</bundles_post_ra>
